<compile_context>
chip_gen: v7x
topology: tpu7x:2x2x1
jax: 0.10.0
libtpu: 0.0.40
codegen_flags: <defaults>
</compile_context>

<pallas_src>
import functools

import numpy as np
import jax
import jax.numpy as jnp
from jax.experimental import pallas as pl
from jax.experimental.pallas import tpu as pltpu


def _ntxent_kernel(zjs_ref, zis_ref, loss_ref, *, batch_size, temperature,
                   use_cosine, mxu_bf16):
    """zjs_ref/zis_ref: (B, D) in VMEM (any float dtype).  loss_ref: (1,1) f32."""
    n = 2 * batch_size
    inv_t = jnp.float32(1.0 / temperature)

    zj = zjs_ref[...].astype(jnp.float32)                          # (B, D)
    zi = zis_ref[...].astype(jnp.float32)                          # (B, D)

    if use_cosine:
        # torch CosineSimilarity eps: max(||x||*||y||, 1e-8).  Per-row clamp
        # max(||x||^2, 1e-8) == max(||x||, 1e-4) matches it for non-degenerate
        # rows (precondition: row norms not below ~1e-4).  rsqrt -> EUP slot.
        def _norm(v):
            ss = jnp.sum(v * v, axis=-1, keepdims=True)
            return v * jax.lax.rsqrt(jnp.maximum(ss, jnp.float32(1e-8)))
        zj_n = _norm(zj)
        zi_n = _norm(zi)
    else:
        zj_n, zi_n = zj, zi

    # Positive logits directly from the halves (sim matrix is symmetric, so the
    # +B and -B diagonals are identical):  O(N*D) instead of O(N^2).
    p = inv_t * jnp.sum(zj_n * zi_n, axis=-1, keepdims=True)       # (B, 1)
    pos = jnp.concatenate([p, p], axis=0)                          # (2B, 1)

    # In-kernel concat matches torch.cat([zjs, zis], dim=0).
    x_n = jnp.concatenate([zj_n, zi_n], axis=0)                    # (2B, D)

    # Per-row diagonal (self-similarity) logit; (N,1) vector replaces the old
    # (N,N) iota/compare/select diagonal mask.
    diag = inv_t * jnp.sum(x_n * x_n, axis=-1, keepdims=True)      # (2B, 1)

    # Fold 1/temperature into one operand -> logits straight off the MXU.
    lhs = x_n * inv_t
    rhs = x_n
    if mxu_bf16:
        # Only taken for large N, D (see wrapper gate); f32 accumulate on MXU.
        lhs = lhs.astype(jnp.bfloat16)
        rhs = rhs.astype(jnp.bfloat16)
    logits = jax.lax.dot_general(
        lhs, rhs, (((1,), (1,)), ((), ())),
        preferred_element_type=jnp.float32)                        # (2B, 2B)

    # logsumexp over j != i:  m over the full (unmasked) row is >= the masked
    # max, so it is a valid LSE shift; the j == i term is subtracted back out.
    m = jnp.max(logits, axis=-1, keepdims=True)                    # (2B, 1)
    s_all = jnp.sum(jnp.exp(logits - m), axis=-1, keepdims=True)   # (2B, 1)
    s_off = jnp.maximum(s_all - jnp.exp(diag - m), jnp.float32(1e-30))
    lse = m + jnp.log(s_off)                                       # (2B, 1)

    per_row = lse - pos                                            # (2B, 1)
    loss_ref[...] = jnp.sum(per_row, keepdims=True) * jnp.float32(1.0 / n)


def ntxent_loss(zis, zjs, *, temperature=0.5, use_cosine_similarity=True,
                mxu_bf16=None):
    """Pallas implementation of NTXentLoss.forward(zis, zjs) -> scalar loss."""
    assert zis.shape == zjs.shape and zis.ndim == 2
    batch_size, feat_dim = zis.shape
    n = 2 * batch_size

    if mxu_bf16 is None:
        # Auto-gate: bf16 MXU operands only pay off once the matmul is
        # throughput-bound; at small N/D the two casts cost more than the MXU
        # saves, and v5e's VPU/EUP have no bf16 support for intermediates.
        mxu_bf16 = (n >= 256) and (feat_dim >= 256)

    kernel = functools.partial(
        _ntxent_kernel,
        batch_size=batch_size,
        temperature=float(temperature),
        use_cosine=bool(use_cosine_similarity),
        mxu_bf16=bool(mxu_bf16),
    )
    itemsize = jnp.dtype(zis.dtype).itemsize
    cost = pl.CostEstimate(
        flops=2 * n * n * feat_dim + 6 * n * feat_dim,
        transcendentals=n * n + 3 * n,            # exp + rsqrt + log
        bytes_accessed=2 * batch_size * feat_dim * itemsize + 4,
    )
    out = pl.pallas_call(
        kernel,
        out_shape=jax.ShapeDtypeStruct((1, 1), jnp.float32),
        in_specs=[pl.BlockSpec(memory_space=pltpu.MemorySpace.VMEM),
                  pl.BlockSpec(memory_space=pltpu.MemorySpace.VMEM)],
        out_specs=pl.BlockSpec(memory_space=pltpu.MemorySpace.VMEM),
        cost_estimate=cost,
    )(zjs, zis)                                   # native dtype; no wrapper cast
    return out[0, 0]


def _ref_ntxent(zis, zjs, batch_size, temperature):
    """Pure numpy replica of the PyTorch forward (cosine similarity path)."""
    zis = np.asarray(zis, dtype=np.float64)
    zjs = np.asarray(zjs, dtype=np.float64)
    reps = np.concatenate([zjs, zis], axis=0)
    nrm = np.linalg.norm(reps, axis=-1, keepdims=True)
    sim = (reps @ reps.T) / np.maximum(nrm * nrm.T, 1e-8)

    B = batch_size
    l_pos = np.diag(sim, B)
    r_pos = np.diag(sim, -B)
    positives = np.concatenate([l_pos, r_pos]).reshape(2 * B, 1)
    mask = (1 - (np.eye(2 * B) + np.eye(2 * B, k=-B) + np.eye(2 * B, k=B))).astype(bool)
    negatives = sim[mask].reshape(2 * B, -1)
    logits = np.concatenate([positives, negatives], axis=1) / temperature

    # CrossEntropyLoss(reduction='sum') with labels == 0
    m = logits.max(-1, keepdims=True)
    lse = m[:, 0] + np.log(np.exp(logits - m).sum(-1))
    loss = np.sum(lse - logits[:, 0])
    return loss / (2 * B)


def _init_projection_head_params(key, ar_hid_dim, final_out_channels):
    # Deterministic init of the module's projection_head parameters
    # (Linear -> BatchNorm1d -> ReLU -> Dropout -> Linear).
    # TODO(synk): projection_head (and dropout) is never used in forward(), so
    # it is initialized here only for shape parity and not wired into the kernel.
    h = final_out_channels // 2
    o = final_out_channels // 4
    k1, k2 = jax.random.split(key)
    return {
        "w1": jax.random.normal(k1, (ar_hid_dim, h), jnp.float32) * 0.02,
        "b1": jnp.zeros((h,), jnp.float32),
        "bn_gamma": jnp.ones((h,), jnp.float32),
        "bn_beta": jnp.zeros((h,), jnp.float32),
        "w2": jax.random.normal(k2, (h, o), jnp.float32) * 0.02,
        "b2": jnp.zeros((o,), jnp.float32),
    }


if __name__ == "__main__":
    key = jax.random.PRNGKey(0)
    k1, k2, k3 = jax.random.split(key, 3)

    # config: AR_hid_dim=32, final_out_channels=16, dropout=0.1 (unused in forward)
    batch_size, feat_dim = 8, 32
    temperature = 0.5

    zis = jax.random.normal(k1, (batch_size, feat_dim), jnp.float32)
    zjs = jax.random.normal(k2, (batch_size, feat_dim), jnp.float32)
    _ = _init_projection_head_params(k3, ar_hid_dim=32, final_out_channels=16)

    loss = ntxent_loss(zis, zjs, temperature=temperature, use_cosine_similarity=True)
    loss = jax.block_until_ready(loss)

    ref = _ref_ntxent(zis, zjs, batch_size, temperature)
    np.testing.assert_allclose(float(loss), float(ref), rtol=1e-4, atol=1e-4)
    print("KERNEL_OK")
</pallas_src>

<mosaic_0001>
module attributes {stable_mosaic.version = 11 : i64} {
  func.func @_ntxent_kernel(%arg0: memref<8x32xf32, #tpu.memory_space<vmem>>, %arg1: memref<8x32xf32, #tpu.memory_space<vmem>>, %arg2: memref<1x1xf32, #tpu.memory_space<vmem>>) attributes {dimension_semantics = [], scalar_prefetch = 0 : i64, scratch_operands = 0 : i64, tpu.core_type = #tpu.core_type<tc>} {
    %c0 = arith.constant 0 : index
    %c0_0 = arith.constant 0 : index
    %0 = vector.load %arg0[%c0, %c0_0] : memref<8x32xf32, #tpu.memory_space<vmem>>, vector<8x32xf32>
    %c0_1 = arith.constant 0 : index
    %c0_2 = arith.constant 0 : index
    %1 = vector.load %arg1[%c0_1, %c0_2] : memref<8x32xf32, #tpu.memory_space<vmem>>, vector<8x32xf32>
    %2 = arith.mulf %0, %0 : vector<8x32xf32>
    %cst = arith.constant dense<0.000000e+00> : vector<8xf32>
    %3 = vector.multi_reduction <add>, %2, %cst [1] : vector<8x32xf32> to vector<8xf32>
    %4 = vector.shape_cast %3 : vector<8xf32> to vector<8x1xf32>
    %cst_3 = arith.constant 9.99999993E-9 : f32
    %5 = vector.broadcast %cst_3 : f32 to vector<8x1xf32>
    %6 = arith.maximumf %4, %5 : vector<8x1xf32>
    %7 = math.rsqrt %6 : vector<8x1xf32>
    %8 = vector.broadcast %7 : vector<8x1xf32> to vector<8x32xf32>
    %9 = arith.mulf %0, %8 : vector<8x32xf32>
    %10 = arith.mulf %1, %1 : vector<8x32xf32>
    %cst_4 = arith.constant dense<0.000000e+00> : vector<8xf32>
    %11 = vector.multi_reduction <add>, %10, %cst_4 [1] : vector<8x32xf32> to vector<8xf32>
    %12 = vector.shape_cast %11 : vector<8xf32> to vector<8x1xf32>
    %cst_5 = arith.constant 9.99999993E-9 : f32
    %13 = vector.broadcast %cst_5 : f32 to vector<8x1xf32>
    %14 = arith.maximumf %12, %13 : vector<8x1xf32>
    %15 = math.rsqrt %14 : vector<8x1xf32>
    %16 = vector.broadcast %15 : vector<8x1xf32> to vector<8x32xf32>
    %17 = arith.mulf %1, %16 : vector<8x32xf32>
    %18 = arith.mulf %9, %17 : vector<8x32xf32>
    %cst_6 = arith.constant dense<0.000000e+00> : vector<8xf32>
    %19 = vector.multi_reduction <add>, %18, %cst_6 [1] : vector<8x32xf32> to vector<8xf32>
    %20 = vector.shape_cast %19 : vector<8xf32> to vector<8x1xf32>
    %cst_7 = arith.constant 2.000000e+00 : f32
    %21 = vector.broadcast %cst_7 : f32 to vector<8x1xf32>
    %22 = arith.mulf %21, %20 : vector<8x1xf32>
    %23 = tpu.concatenate %22, %22 in 0 : vector<8x1xf32>, vector<8x1xf32> -> vector<16x1xf32>
    %24 = tpu.concatenate %9, %17 in 0 : vector<8x32xf32>, vector<8x32xf32> -> vector<16x32xf32>
    %25 = arith.mulf %24, %24 : vector<16x32xf32>
    %cst_8 = arith.constant dense<0.000000e+00> : vector<16xf32>
    %26 = vector.multi_reduction <add>, %25, %cst_8 [1] : vector<16x32xf32> to vector<16xf32>
    %27 = vector.shape_cast %26 : vector<16xf32> to vector<16x1xf32>
    %cst_9 = arith.constant 2.000000e+00 : f32
    %28 = vector.broadcast %cst_9 : f32 to vector<16x1xf32>
    %29 = arith.mulf %28, %27 : vector<16x1xf32>
    %cst_10 = arith.constant 2.000000e+00 : f32
    %30 = vector.broadcast %cst_10 : f32 to vector<16x32xf32>
    %31 = arith.mulf %24, %30 : vector<16x32xf32>
    %cst_11 = arith.constant dense<0.000000e+00> : vector<16x16xf32>
    %32 = tpu.matmul %31, %24, %cst_11 {dimension_numbers = #tpu.dot_dimension_numbers<[1], [1], [0], [0], [0, 0, 1, 0], [], []>} : vector<16x32xf32>, vector<16x32xf32>, vector<16x16xf32> -> vector<16x16xf32>
    %cst_12 = arith.constant dense<0xFF800000> : vector<16xf32>
    %33 = vector.multi_reduction <maximumf>, %32, %cst_12 [1] : vector<16x16xf32> to vector<16xf32>
    %34 = vector.shape_cast %33 : vector<16xf32> to vector<16x1xf32>
    %35 = vector.broadcast %34 : vector<16x1xf32> to vector<16x16xf32>
    %36 = arith.subf %32, %35 : vector<16x16xf32>
    %37 = math.exp %36 : vector<16x16xf32>
    %cst_13 = arith.constant dense<0.000000e+00> : vector<16xf32>
    %38 = vector.multi_reduction <add>, %37, %cst_13 [1] : vector<16x16xf32> to vector<16xf32>
    %39 = vector.shape_cast %38 : vector<16xf32> to vector<16x1xf32>
    %40 = arith.subf %29, %34 : vector<16x1xf32>
    %41 = math.exp %40 : vector<16x1xf32>
    %42 = arith.subf %39, %41 : vector<16x1xf32>
    %cst_14 = arith.constant 1.000000e-30 : f32
    %43 = vector.broadcast %cst_14 : f32 to vector<16x1xf32>
    %44 = arith.maximumf %42, %43 : vector<16x1xf32>
    %45 = math.log %44 : vector<16x1xf32>
    %46 = arith.addf %34, %45 : vector<16x1xf32>
    %47 = arith.subf %46, %23 : vector<16x1xf32>
    %48 = vector.shape_cast %47 : vector<16x1xf32> to vector<1x16x1xf32>
    %cst_15 = arith.constant dense<0.000000e+00> : vector<1xf32>
    %49 = vector.multi_reduction <add>, %48, %cst_15 [1, 2] : vector<1x16x1xf32> to vector<1xf32>
    %50 = vector.shape_cast %49 : vector<1xf32> to vector<1x1x1xf32>
    %51 = vector.extract %50[0, 0, 0] : f32 from vector<1x1x1xf32>
    %52 = vector.broadcast %51 : f32 to vector<1x1xf32>
    %cst_16 = arith.constant 6.250000e-02 : f32
    %53 = vector.broadcast %cst_16 : f32 to vector<1x1xf32>
    %54 = arith.mulf %52, %53 : vector<1x1xf32>
    %c0_17 = arith.constant 0 : index
    %c0_18 = arith.constant 0 : index
    %55 = vector.load %arg2[%c0_17, %c0_18] : memref<1x1xf32, #tpu.memory_space<vmem>>, vector<1x1xf32>
    tpu.vector_store %arg2[%c0_17, %c0_18], %54 {strides = array<i32>} : memref<1x1xf32, #tpu.memory_space<vmem>>, vector<1x1xf32>,
    return
  }
}

</mosaic_0001>

<bundles_post_ra>
// kernel: tpu_custom_call.1
= control target key start
LH: loop header
LB: loop body
LE: loop exit
PB: predicated region body
PF: predicated region fallthrough
CT: control target
= control target key end

     0   :  { %7 = vsyncpa [#allocation3], 0  ;;  %s408_s0 = inlined_call_operand.hbm [shape: f32[8,32], index: 0, kind: input, shape index: {}]   ;;  %s409_s1 = inlined_call_operand.hbm [shape: f32[8,32], index: 1, kind: input, shape index: {}]   ;;  %s410_s2 = inlined_call_operand.hbm [shape: f32[1,1], index: 2, kind: output, shape index: {}]  }
   0x1   :  { %8 = vsyncpa [#allocation6], 0 }
   0x2   :  { %9 = vsyncpa [#allocation4], 0  ;;  %s341_s9 = smov [#allocation2]   ;;  %s342_s11 = smov [#allocation5]  }
   0x3   :  { %s16_s10 = sshll.u32 %s341_s9, 4  ;;  %s26_s12 = sshll.u32 %s342_s11, 4  ;;  %s17_s10 = int_to_ptr.vmem [resolvable:$true] %s16_s10  ;;  %s27_s12 = int_to_ptr.vmem [resolvable:$true] %s26_s12 }
   0x4   :  { %s269_s15 = scalar_lea.hbm %s408_s0, 128 }
   0x5   :  { %p270_p0 = scmp.ne.s32.totalorder %s408_s0, %s269_s15  ;;  %p273_p1 = scmp.lt.u32.totalorder %s269_s15, %s408_s0 }
   0x7   :  { %p275_p2 = pnand %p273_p1, %p270_p0 }
   0x9   :  { %278 = shalt.err (!%p275_p2)
}
   0xa   :  { %s279_s20 = scalar_lea.vmem %s17_s10, 128  ;;  %p284_p4 = scmp.lt.s32.totalorder %s17_s10, %s17_s10 }
   0xb   :  { %p280_p3 = scmp.ne.s32.totalorder %s17_s10, %s279_s20  ;;  %p285_p5 = scmp.lt.s32.totalorder %s279_s20, %s279_s20 }
   0xd   :  { %p286_p6 = por %p285_p5, %p284_p4 }
   0xf   :  { %p287_p7 = pnand %p286_p6, %p280_p3 }
  0x11   :  { %290 = shalt.err (!%p287_p7)
}
  0x12   :  { %19 = dma.hbm_to_vmem [thread:$0]  %s408_s0, 128, %s17_s10, [#allocation3]  }
  0x13   :  { %s291_s25 = scalar_lea.hbm %s409_s1, 128 }
  0x14   :  { %p292_p8 = scmp.ne.s32.totalorder %s409_s1, %s291_s25  ;;  %p295_p9 = scmp.lt.u32.totalorder %s291_s25, %s409_s1 }
  0x16   :  { %p297_p10 = pnand %p295_p9, %p292_p8 }
  0x18   :  { %300 = shalt.err (!%p297_p10)
}
  0x19   :  { %s301_s30 = scalar_lea.vmem %s27_s12, 128  ;;  %p306_p12 = scmp.lt.s32.totalorder %s27_s12, %s27_s12 }
  0x1a   :  { %p302_p11 = scmp.ne.s32.totalorder %s27_s12, %s301_s30  ;;  %p307_p13 = scmp.lt.s32.totalorder %s301_s30, %s301_s30 }
  0x1c   :  { %p308_p0 = por %p307_p13, %p306_p12 }
  0x1e   :  { %p309_p1 = pnand %p308_p0, %p302_p11 }
  0x20   :  { %312 = shalt.err (!%p309_p1)
}
  0x21   :  { %29 = dma.hbm_to_vmem [thread:$0]  %s409_s1, 128, %s27_s12, [#allocation6]  }
  0x22   :  { %335 = dma.done.wait [#allocation3], 128  }
  0x23   :  { %336 = vsyncadd [#allocation3], 4294967168 }
  0x24   :  { %337 = dma.done.wait [#allocation6], 128  }
  0x25   :  { %338 = vsyncadd [#allocation6], 4294967168  ;;  %v36_v0 = vld [vmem:[#allocation2] sm:$0xff]  ;;  %vm39_vm0 = vcmask 261120   ;;  %v37_v1 = vld [vmem:[#allocation5] sm:$0xff]  ;;  %vm157_vm2 = vcmask 130048  }
  0x26   :  { %v38_v2 = vmul.f32 %v36_v0, %v36_v0  ;;  %v46_v3 = vmul.f32 %v37_v1, %v37_v1  ;;  %vm243_vm1 = vmpackc.low %vm39_vm0, %vm39_vm0  ;;  %vm194_vm3 = vcmask 7168   ;;  %s343_s1 = smov [#allocation7]   ;;  %vm209_vm4 = vcmask 0  }
  0x27   :  { %s217_s4 = sshll.u32 %s343_s1, 4  ;;  %s218_s4 = int_to_ptr.vmem [resolvable:$true] %s217_s4 }
  0x28   :  { %v40_v4 = vsel %vm39_vm0, %v38_v2, 0.0  ;;  %v47_v5 = vsel %vm39_vm0, %v46_v3, 0.0  ;;  %s313_s6 = scalar_lea.vmem %s218_s4, 16  ;;  %s317_s7 = scalar_lea.vmem %s218_s4, 32 }
  0x29   :  { %41 = vadd.xlane.f32.xlu0 %v40_v4  ;;  %p314_p2 = scmp.ne.s32.totalorder %s218_s4, %s313_s6  ;;  %p318_p3 = scmp.lt.s32.totalorder %s218_s4, %s218_s4 }
  0x2a   :  { %p319_p4 = scmp.lt.s32.totalorder %s317_s7, %s313_s6 }
  0x2c   :  { %p320_p5 = por %p319_p4, %p318_p3 }
  0x2d   :  { %48 = vadd.xlane.f32.xlu0 %v47_v5 }
  0x2e   :  { %p321_p6 = pnand %p320_p5, %p314_p2 }
  0xb6   :  { %v42_v6 = vpop.xlane.xlu0 %41 }
  0xb7   :  { %v43_v7 = vmax.f32 %v42_v6, 1e-08 }
  0xb9   :  { %253 = vrsqrt.f32 %v43_v7 }
  0xba   :  { %v49_v8 = vpop.xlane.xlu0 %48 }
  0xbb   :  { %v50_v9 = vmax.f32 %v49_v8, 1e-08 }
  0xbd   :  { %255 = vrsqrt.f32 %v50_v9 }
  0xc3   :  { %v254_v10 = vpop.eup %253 }
  0xc4   :  { %v45_v11 = vmul.f32 %v254_v10, %v36_v0 }
  0xc6   :  { %v68_v12 = vmul.f32 2.0, %v45_v11  ;;  %v58_v13 = vmul.f32 %v45_v11, %v45_v11 }
  0xc7   :  { %v256_v14 = vpop.eup %255 }
  0xc8   :  { %239 = vmatprep.mubr.msk.f32.mxu0 %vm39_vm0, %v68_v12  ;;  %v60_v15 = vsel %vm39_vm0, %v58_v13, 0.0  ;;  %v52_v16 = vmul.f32 %v256_v14, %v37_v1 }
  0xc9   :  { %61 = vadd.xlane.f32.xlu0 %v60_v15 }
  0xca   :  { %v242_v17 = vpack.c.bf16 %v52_v16, %v45_v11  ;;  %v53_v18 = vmul.f32 %v52_v16, %v45_v11  ;;  %v69_v19 = vmul.f32 2.0, %v52_v16  ;;  %v59_v24 = vmul.f32 %v52_v16, %v52_v16 }
  0xcc   :  { %244 = vmatprep.subr.msk.bf16.mxu0 %vm243_vm1, %v242_v17  ;;  %v63_v25 = vsel %vm39_vm0, %v59_v24, 0.0  ;;  %v54_v36 = vsel %vm39_vm0, %v53_v18, 0.0 }
  0xcd   :  { %247 = vmatpush3.bf16.xpose.msk.msra.mxu0 %vm243_vm1, %v242_v17 }
  0xd4   :  { %240 = vmatmul.mubr.msk.f32.vlgmr.msra.gmra.mrb[0].mxu0 %vm39_vm0, %v69_v19 }
 0x156   :  { %v62_v37 = vpop.xlane.xlu0 %61 }
 0x157   :  { %v66_v39 = vmul.f32 2.0, %v62_v37 }
 0x1a7   :  { %v241_v20 = vpop.f32.mrb[0].mxu0 }
 0x1a8   :  { %v148_v21 = vpop.f32.mrb[1].mxu0  ;;  %v161_v23 = vsel %vm157_vm2, %v241_v20, -inf }
 0x1a9   :  { %v158_v22 = vsel %vm157_vm2, %v148_v21, -inf }
 0x1aa   :  { %159 = vmax.xlane.f32.xlu1 %v158_v22 }
 0x1ae   :  { %162 = vmax.xlane.f32.xlu1 %v161_v23 }
 0x1b2   :  { %64 = vadd.xlane.f32.xlu1 %v63_v25 }
 0x237   :  { %v160_v26 = vpop.xlane.xlu1 %159 }
 0x238   :  { %v164_v27 = vsub.f32 %v148_v21, %v160_v26  ;;  %v176_v40 = vsub.f32 %v66_v39, %v160_v26 }
 0x23a   :  { %v166_v28 = vmul.f32 1.442695, %v164_v27  ;;  %v178_v42 = vmul.f32 1.442695, %v176_v40 }
 0x23b   :  { %v163_v29 = vpop.xlane.xlu1 %162 }
 0x23c   :  { %257 = vpow2.f32 %v166_v28  ;;  %v165_v30 = vsub.f32 %v241_v20, %v163_v29 }
 0x23e   :  { %v168_v31 = vmul.f32 1.442695, %v165_v30 }
 0x23f   :  { %v65_v38 = vpop.xlane.xlu1 %64 }
 0x240   :  { %259 = vpow2.f32 %v168_v31  ;;  %v67_v41 = vmul.f32 2.0, %v65_v38 }
 0x241   :  { %261 = vpow2.f32 %v178_v42 }
 0x242   :  { %v177_v43 = vsub.f32 %v67_v41, %v163_v29 }
 0x244   :  { %v180_v44 = vmul.f32 1.442695, %v177_v43 }
 0x246   :  { %v258_v32 = vpop.eup %257  ;;  %263 = vpow2.f32 %v180_v44 }
 0x247   :  { %v170_v33 = vsel %vm157_vm2, %v258_v32, 0.0 }
 0x248   :  { %171 = vadd.xlane.f32.xlu0 %v170_v33 }
 0x24a   :  { %v260_v34 = vpop.eup %259 }
 0x24b   :  { %v173_v35 = vsel %vm157_vm2, %v260_v34, 0.0  ;;  %v262_v45 = vpop.eup %261 }
 0x24c   :  { %174 = vadd.xlane.f32.xlu1 %v173_v35  ;;  %55 = vadd.xlane.f32.xlu0 %v54_v36 }
 0x250   :  { %v264_v49 = vpop.eup %263 }
 0x2d5   :  { %v172_v46 = vpop.xlane.xlu0 %171 }
 0x2d6   :  { %v182_v47 = vsub.f32 %v172_v46, %v262_v45 }
 0x2d8   :  { %v184_v48 = vmax.f32 %v182_v47, 1e-30 }
 0x2d9   :  { %v175_v50 = vpop.xlane.xlu1 %174  ;;  %v56_v55 = vpop.xlane.xlu0 %55 }
 0x2da   :  { %265 = vlog2.f32 %v184_v48  ;;  %v183_v51 = vsub.f32 %v175_v50, %v264_v49  ;;  %v57_v59 = vmul.f32 2.0, %v56_v55 }
 0x2dc   :  { %v185_v52 = vmax.f32 %v183_v51, 1e-30 }
 0x2de   :  { %267 = vlog2.f32 %v185_v52 }
 0x2e4   :  { %v266_v53 = vpop.eup %265 }
 0x2e5   :  { %v187_v54 = vmul.f32 0.6931472, %v266_v53 }
 0x2e7   :  { %v190_v56 = vadd.f32 %v187_v54, %v160_v26 }
 0x2e8   :  { %v268_v57 = vpop.eup %267 }
 0x2e9   :  { %v189_v58 = vmul.f32 0.6931472, %v268_v57  ;;  %v192_v61 = vsub.f32 %v190_v56, %v57_v59 }
 0x2eb   :  { %v191_v60 = vadd.f32 %v189_v58, %v163_v29  ;;  %v195_v63 = vsel %vm194_vm3, %v192_v61, 0.0 }
 0x2ed   :  { %v193_v62 = vsub.f32 %v191_v60, %v57_v59 }
 0x2ef   :  { %v196_v0 = vsel %vm194_vm3, %v193_v62, 0.0 }
 0x2f0   :  { %v197_v1 = vadd.f32 %v196_v0, %v195_v63 }
 0x2f2   :  { %198 = vadd.xlane.f32.xlu1 %v197_v1 }
 0x37f   :  { %v199_v2 = vpop.xlane.xlu1 %198 }
 0x380   :  { %v200_v3 = vrot.slane %v199_v2, 4 }
 0x382   :  { %v201_v4 = vadd.f32 %v200_v3, %v199_v2 }
 0x384   :  { %v202_v5 = vrot.slane %v201_v4, 2 }
 0x386   :  { %v203_v6 = vadd.f32 %v202_v5, %v201_v4 }
 0x388   :  { %v204_v7 = vrot.slane %v203_v6, 1 }
 0x38a   :  { %v205_v8 = vadd.f32 %v204_v7, %v203_v6 }
 0x38c   :  { %248 = vpush %v205_v8 }
 0x3bd   :  { %s249_s5 = spop %248 }
 0x3be   :  { %v207_v9 = vstv %s249_s5 }
 0x3bf   :  { %v208_v10 = vmul.f32 0.0625, %v207_v9 }
 0x3c1   :  { %210 = vst.msk [vmem:[#allocation7] sm:$0x1] %vm209_vm4, %v208_v10 }
 0x3c2   :  { %324 = shalt.err (!%p321_p6)
}
 0x3c3   :  { %s325_s10 = scalar_lea.hbm %s410_s2, 16 }
 0x3c4   :  { %p326_p7 = scmp.ne.s32.totalorder %s410_s2, %s325_s10  ;;  %p329_p8 = scmp.lt.u32.totalorder %s325_s10, %s410_s2 }
 0x3c6   :  { %p331_p9 = pnand %p329_p8, %p326_p7 }
 0x3c8   :  { %334 = shalt.err (!%p331_p9)
}
 0x3c9   :  { %220 = dma.vmem_to_hbm [thread:$0]  %s218_s4, 16, %s410_s2, [#allocation4]  }
 0x3ca   :  { %339 = dma.done.wait [#allocation4], 16  }
 0x3cb   :  { %340 = vsyncadd [#allocation4], 4294967280 }
 0x3cc   :  { %224 = vsyncpa [#allocation3], 1 }
 0x3cd   :  { %225 = vsyncpa [#allocation6], 1 }
 0x3ce   :  { %226 = vsyncpa [#allocation4], 1 }

</bundles_post_ra>
